<compile_context>
chip_gen: v7x
topology: tpu7x:2x2x1
jax: 0.10.0
libtpu: 0.0.40
codegen_flags: <defaults>
</compile_context>

<pallas_src>
import functools

import jax
import jax.numpy as jnp
from jax import lax
from jax.experimental import pallas as pl
from jax.experimental.pallas import tpu as pltpu


def _focal_loss_kernel(*refs, gamma, temperature, eps, batch, has_cw):
    if has_cw:
        logits_ref, labels_ref, cw_ref, out_ref = refs
    else:
        logits_ref, labels_ref, out_ref = refs
        cw_ref = None

    tb, n_classes = logits_ref.shape

    # Natural-layout (TB, C) tile straight from HBM (single pass, no XLA
    # transpose in the wrapper).  Upcast to f32 in-register and relayout on
    # the XLU to the lane-dense (C, TB) orientation the sublane-reduction math
    # below wants; the transpose is hidden under the next tile's DMA.
    x = jnp.transpose(logits_ref[...].astype(jnp.float32))      # (C, TB)
    if float(temperature) != 1.0:
        x = x * jnp.float32(1.0 / temperature)

    # Softmax statistics over the class (sublane) axis — cheap XLU reductions.
    m = jnp.max(x, axis=0, keepdims=True)                        # (1, TB)
    e = jnp.exp(x - m)                                           # (C, TB)
    denom = jnp.sum(e, axis=0, keepdims=True)                    # (1, TB)

    # One-hot selection mask built from integer labels (no dense one-hot in
    # HBM); gather the target-class logit via a masked sublane sum.
    cls = lax.broadcasted_iota(jnp.int32, (n_classes, tb), 0)
    sel = (cls == labels_ref[...]).astype(jnp.float32)           # (C, TB)
    x_t = jnp.sum(sel * x, axis=0, keepdims=True)                # (1, TB)

    log_sm_t = (x_t - m) - jnp.log(denom)                        # log_softmax @ target
    # softmax @ target: one EUP exp on a (1, TB) row instead of another
    # (C, TB) multiply + sublane reduce.
    sm_t = jnp.exp(log_sm_t) + eps

    base = 1.0 - sm_t
    g = float(gamma)
    if g == 1.0:
        fw = base
    elif g.is_integer():
        fw = base ** int(g)
    else:
        # torch.pow of a slightly negative base (sm_t can exceed 1 by eps)
        # with a non-integer exponent would NaN; clamp instead (documented
        # intentional deviation).
        fw = jnp.power(jnp.maximum(base, 0.0), g)

    loss = -fw * log_sm_t                                        # (1, TB)
    if cw_ref is not None:
        # Per-example class weight was gathered in the wrapper: one VPU mul.
        loss = loss * cw_ref[...].astype(jnp.float32)            # (1, TB)

    # Zero out padded columns of a ragged last tile so the wrapper-side
    # sum / true-B reduction stays exact.  Keep this a jnp.where: the padded
    # columns hold unspecified data and may be Inf/NaN locally.
    col = pl.program_id(0) * tb + lax.broadcasted_iota(jnp.int32, (1, tb), 1)
    masked = jnp.where(col < batch, loss, jnp.float32(0.0))
    out_ref[...] = jnp.reshape(masked, out_ref.shape)


def focal_loss(logits, target, class_weights=None, *, gamma=1.0,
               temperature=1.0, eps=1e-6, reduction='mean', block_b=None):
    """Focal loss matching FocalLoss(gamma, temperature, from_logits=True,
    multilabel=False, reduction=...) for (B, C) logits and integer targets (B,).
    Pass bf16 logits from the producer to halve the dominant HBM read; all math
    is done in f32 vregs inside the kernel.
    """
    B, C = logits.shape

    # --- batch tile size ---------------------------------------------------
    # Tiles are (TB, C); TB is a multiple of 128 so the lane-dense (1, TB)
    # labels / output rows stay unmasked full-width vsts.  For mid-size B pick
    # TB = round_up(cdiv(B, 2), 128) so grid >= 2 and v7x's second TensorCore
    # participates; cap at block_b to amortise the ~0.35 us grid-step overhead
    # while keeping the (lane-padded) double-buffered tile well inside VMEM.
    if block_b is None:
        block_b = 8192
    block_b = max((block_b // 128) * 128, 128)
    if B <= 128:
        tb = B                                    # single full-extent tile
    else:
        tb = min(block_b, ((pl.cdiv(B, 2) + 127) // 128) * 128)
    grid = pl.cdiv(B, tb)

    labels_row = target.astype(jnp.int32).reshape(1, B)          # (1, B)

    has_cw = class_weights is not None
    inputs = [logits, labels_row]
    in_specs = [
        pl.BlockSpec((tb, C), lambda i: (i, 0)),    # contiguous HBM chunk/step
        pl.BlockSpec((1, tb), lambda i: (0, i)),
    ]
    bytes_accessed = B * C * logits.dtype.itemsize + B * 4 + grid * tb * 4
    if has_cw:
        # Gather the target-class weight per example in the wrapper (tiny) and
        # stream it as another lane-dense (1, TB) row.
        cw_row = jnp.asarray(class_weights, jnp.float32).reshape(-1)[
            target.astype(jnp.int32)].reshape(1, B)
        inputs.append(cw_row)
        in_specs.append(pl.BlockSpec((1, tb), lambda i: (0, i)))
        bytes_accessed += B * 4

    kernel = functools.partial(
        _focal_loss_kernel, gamma=gamma, temperature=temperature, eps=eps,
        batch=B, has_cw=has_cw)

    partial_losses = pl.pallas_call(
        kernel,
        out_shape=jax.ShapeDtypeStruct((grid, 1, tb), jnp.float32),
        grid=(grid,),
        in_specs=in_specs,
        out_specs=pl.BlockSpec((1, 1, tb), lambda i: (i, 0, 0)),
        compiler_params=pltpu.CompilerParams(
            dimension_semantics=(pltpu.PARALLEL,),
            vmem_limit_bytes=48 * 1024 * 1024),
        cost_estimate=pl.CostEstimate(
            flops=10 * B * C,
            transcendentals=B * C + 2 * B,
            bytes_accessed=bytes_accessed),
    )(*inputs)

    if reduction == 'mean':
        return jnp.sum(partial_losses) / B
    if reduction == 'sum':
        return jnp.sum(partial_losses)
    # 'none': per-example losses; padded columns are exact zeros.
    return partial_losses.reshape(-1)[:B]


def focal_loss_reference(logits, target, class_weights=None, *, gamma=1.0,
                         temperature=1.0, eps=1e-6, reduction='mean'):
    """Pure-JAX reference mirroring the PyTorch forward."""
    B, C = logits.shape
    if class_weights is None:
        class_weights = jnp.ones((C, 1), jnp.float32)
    onehot = jax.nn.one_hot(target, C, dtype=jnp.float32)
    x = logits.astype(jnp.float32) / temperature
    log_sm = jax.nn.log_softmax(x, axis=-1)
    sm = jax.nn.softmax(x, axis=-1) + eps
    fw = (1.0 - sm) ** gamma
    focal_weights = -onehot * fw * log_sm                                # (B, C)
    cw = jnp.broadcast_to(jnp.asarray(class_weights, jnp.float32), (B, C, 1))
    loss = jnp.squeeze(focal_weights[:, None, :] @ cw, axis=(1, 2))      # (B,)
    if reduction == 'mean':
        return jnp.mean(loss)
    if reduction == 'sum':
        return jnp.sum(loss)
    return loss


if __name__ == "__main__":
    key = jax.random.PRNGKey(0)
    B, C = 512, 16          # IntentClassification: (batch_size, n_classes)
    k1, k2, k3, k4 = jax.random.split(key, 4)

    # --- check 1: grid=2 (>=2-tiles rule), non-uniform class weights,
    #              module defaults gamma=1, temperature=1 --------------------
    logits = jax.random.normal(k1, (B, C), dtype=jnp.float32)
    labels = jax.random.randint(k2, (B,), 0, C, dtype=jnp.int32)
    class_weights = 1.0 + jax.random.uniform(k4, (C, 1), dtype=jnp.float32)

    out = focal_loss(logits, labels, class_weights, gamma=1.0, temperature=1.0)
    out = jax.block_until_ready(out)
    ref = focal_loss_reference(logits, labels, class_weights,
                               gamma=1.0, temperature=1.0)
    assert jnp.allclose(out, ref, rtol=1e-5, atol=1e-6), (out, ref)

    # --- check 2: ragged last tile, no class weights, gamma=2, temperature=2,
    #              'mean' and 'none' reductions -------------------------------
    B2 = 200
    logits2 = jax.random.normal(k3, (B2, C), dtype=jnp.float32)
    labels2 = jax.random.randint(jax.random.fold_in(key, 7), (B2,), 0, C,
                                 dtype=jnp.int32)
    out2 = jax.block_until_ready(
        focal_loss(logits2, labels2, None, gamma=2.0, temperature=2.0))
    ref2 = focal_loss_reference(logits2, labels2, None,
                                gamma=2.0, temperature=2.0)
    assert jnp.allclose(out2, ref2, rtol=1e-5, atol=1e-6), (out2, ref2)

    out2n = jax.block_until_ready(
        focal_loss(logits2, labels2, None, gamma=2.0, temperature=2.0,
                   reduction='none'))
    ref2n = focal_loss_reference(logits2, labels2, None,
                                 gamma=2.0, temperature=2.0, reduction='none')
    assert out2n.shape == (B2,)
    assert jnp.allclose(out2n, ref2n, rtol=1e-5, atol=1e-5), (out2n, ref2n)

    # --- check 3: bf16 logits (half the HBM read), non-integer gamma ---------
    B3 = 384
    logits3 = jax.random.normal(jax.random.fold_in(key, 11),
                                (B3, C)).astype(jnp.bfloat16)
    labels3 = jax.random.randint(jax.random.fold_in(key, 13), (B3,), 0, C,
                                 dtype=jnp.int32)
    out3 = jax.block_until_ready(focal_loss(logits3, labels3, None, gamma=1.5))
    ref3 = focal_loss_reference(logits3, labels3, None, gamma=1.5)
    assert jnp.allclose(out3, ref3, rtol=1e-4, atol=1e-5), (out3, ref3)

    print("KERNEL_OK")
</pallas_src>

<mosaic_0001>
module attributes {stable_mosaic.version = 11 : i64} {
  func.func @_focal_loss_kernel(%arg0: i32, %arg1: memref<256x16xf32, #tpu.memory_space<vmem>>, %arg2: memref<1x256xi32, #tpu.memory_space<vmem>>, %arg3: memref<1x256xf32, #tpu.memory_space<vmem>>, %arg4: memref<1x1x256xf32, #tpu.memory_space<vmem>>) attributes {dimension_semantics = [#tpu.dimension_semantics<parallel>], iteration_bounds = array<i64: 2>, scalar_prefetch = 0 : i64, scratch_operands = 0 : i64, tpu.core_type = #tpu.core_type<tc>, window_params = [{transform_indices = @transform_0, window_bounds = array<i64: 256, 16>}, {transform_indices = @transform_1, window_bounds = array<i64: 1, 256>}, {transform_indices = @transform_2, window_bounds = array<i64: 1, 256>}, {transform_indices = @transform_3, window_bounds = array<i64: 1, 1, 256>}]} {
    %c0 = arith.constant 0 : index
    %c0_0 = arith.constant 0 : index
    %0 = vector.load %arg1[%c0, %c0_0] : memref<256x16xf32, #tpu.memory_space<vmem>>, vector<256x16xf32>
    %1 = tpu.transpose %0, [1, 0] : vector<256x16xf32> -> vector<16x256xf32>
    %cst = arith.constant dense<0xFF800000> : vector<256xf32>
    %2 = vector.multi_reduction <maximumf>, %1, %cst [0] : vector<16x256xf32> to vector<256xf32>
    %3 = vector.shape_cast %2 : vector<256xf32> to vector<1x256xf32>
    %4 = vector.broadcast %3 : vector<1x256xf32> to vector<16x256xf32>
    %5 = arith.subf %1, %4 : vector<16x256xf32>
    %6 = math.exp %5 : vector<16x256xf32>
    %cst_1 = arith.constant dense<0.000000e+00> : vector<256xf32>
    %7 = vector.multi_reduction <add>, %6, %cst_1 [0] : vector<16x256xf32> to vector<256xf32>
    %8 = vector.shape_cast %7 : vector<256xf32> to vector<1x256xf32>
    %9 = tpu.iota {dimensions = array<i32: 0>} : vector<16x256xi32>
    %c0_2 = arith.constant 0 : index
    %c0_3 = arith.constant 0 : index
    %10 = vector.load %arg2[%c0_2, %c0_3] : memref<1x256xi32, #tpu.memory_space<vmem>>, vector<1x256xi32>
    %11 = vector.broadcast %10 : vector<1x256xi32> to vector<16x256xi32>
    %12 = arith.cmpi eq, %9, %11 : vector<16x256xi32>
    %13 = arith.extui %12 : vector<16x256xi1> to vector<16x256xi32>
    %14 = arith.sitofp %13 : vector<16x256xi32> to vector<16x256xf32>
    %15 = arith.mulf %14, %1 : vector<16x256xf32>
    %cst_4 = arith.constant dense<0.000000e+00> : vector<256xf32>
    %16 = vector.multi_reduction <add>, %15, %cst_4 [0] : vector<16x256xf32> to vector<256xf32>
    %17 = vector.shape_cast %16 : vector<256xf32> to vector<1x256xf32>
    %18 = arith.subf %17, %3 : vector<1x256xf32>
    %19 = math.log %8 : vector<1x256xf32>
    %20 = arith.subf %18, %19 : vector<1x256xf32>
    %21 = math.exp %20 : vector<1x256xf32>
    %cst_5 = arith.constant 9.99999997E-7 : f32
    %22 = vector.broadcast %cst_5 : f32 to vector<1x256xf32>
    %23 = arith.addf %21, %22 : vector<1x256xf32>
    %cst_6 = arith.constant 1.000000e+00 : f32
    %24 = vector.broadcast %cst_6 : f32 to vector<1x256xf32>
    %25 = arith.subf %24, %23 : vector<1x256xf32>
    %cst_7 = arith.constant 0.000000e+00 : f32
    %26 = vector.broadcast %cst_7 : f32 to vector<1x256xf32>
    %27 = arith.subf %26, %25 : vector<1x256xf32>
    %28 = arith.mulf %27, %20 : vector<1x256xf32>
    %c0_8 = arith.constant 0 : index
    %c0_9 = arith.constant 0 : index
    %29 = vector.load %arg3[%c0_8, %c0_9] : memref<1x256xf32, #tpu.memory_space<vmem>>, vector<1x256xf32>
    %30 = arith.mulf %28, %29 : vector<1x256xf32>
    %c256_i32 = arith.constant 256 : i32
    %31 = arith.muli %arg0, %c256_i32 : i32
    %32 = tpu.iota {dimensions = array<i32: 1>} : vector<1x256xi32>
    %33 = vector.broadcast %31 : i32 to vector<1x256xi32>
    %34 = arith.addi %33, %32 : vector<1x256xi32>
    %c512_i32 = arith.constant 512 : i32
    %35 = vector.broadcast %c512_i32 : i32 to vector<1x256xi32>
    %36 = arith.cmpi slt, %34, %35 : vector<1x256xi32>
    %cst_10 = arith.constant 0.000000e+00 : f32
    %37 = vector.broadcast %cst_10 : f32 to vector<1x256xf32>
    %38 = arith.select %36, %30, %37 : vector<1x256xi1>, vector<1x256xf32>
    %39 = vector.shape_cast %38 : vector<1x256xf32> to vector<1x1x256xf32>
    %c0_11 = arith.constant 0 : index
    %c0_12 = arith.constant 0 : index
    %c0_13 = arith.constant 0 : index
    %40 = vector.load %arg4[%c0_11, %c0_12, %c0_13] : memref<1x1x256xf32, #tpu.memory_space<vmem>>, vector<1x1x256xf32>
    tpu.vector_store %arg4[%c0_11, %c0_12, %c0_13], %39 {strides = array<i32>} : memref<1x1x256xf32, #tpu.memory_space<vmem>>, vector<1x1x256xf32>,
    return
  }
  func.func @transform_0(%arg0: i32) -> (i32, i32) {
    %c0_i32 = arith.constant 0 : i32
    %c0_i32_0 = arith.constant 0 : i32
    return %arg0, %c0_i32 : i32, i32
  }
  func.func @transform_1(%arg0: i32) -> (i32, i32) {
    %c0_i32 = arith.constant 0 : i32
    %c0_i32_0 = arith.constant 0 : i32
    return %c0_i32, %arg0 : i32, i32
  }
  func.func @transform_2(%arg0: i32) -> (i32, i32) {
    %c0_i32 = arith.constant 0 : i32
    %c0_i32_0 = arith.constant 0 : i32
    return %c0_i32, %arg0 : i32, i32
  }
  func.func @transform_3(%arg0: i32) -> (i32, i32, i32) {
    %c0_i32 = arith.constant 0 : i32
    %c0_i32_0 = arith.constant 0 : i32
    %c0_i32_1 = arith.constant 0 : i32
    return %arg0, %c0_i32, %c0_i32_0 : i32, i32, i32
  }
}

</mosaic_0001>

<bundles_post_ra>
// kernel: tpu_custom_call.1
= control target key start
LH: loop header
LB: loop body
LE: loop exit
PB: predicated region body
PF: predicated region fallthrough
CT: control target
= control target key end

     0   :  { %8 = vsyncpa [#allocation3], 0  ;;  %s889_s0 = inlined_call_operand.vmem [shape: f32[512,16], index: 0, kind: input, shape index: {}]   ;;  %s890_s1 = inlined_call_operand.vmem [shape: s32[1,512], index: 1, kind: input, shape index: {}]   ;;  %s891_s2 = inlined_call_operand.vmem [shape: f32[1,512], index: 2, kind: input, shape index: {}]   ;;  %s892_s3 = inlined_call_operand.hbm [shape: f32[2,1,256], index: 3, kind: output, shape index: {}]  }
   0x1   :  { %10 = vsyncpa [#allocation3 + $0x1], 0  ;;  %s711_s12 = smov 0   ;;  %s713_s13 = smov 0  }
   0x2   :  { %s715_s14 = smov 0   ;;  %s717_s15 = smov 0  }
   0x3 LB: > { %s732_s16 = sadd.s32 4294967295, %s686_s15   ;;  %s547_s17 = sadd.s32 4294967294, %s686_s15   ;;  %s686_s15 = sphi %s717_s15, %s898_s15   ;;  %s682_s14 = sphi %s715_s14, %s897_s14   ;;  %s678_s13 = sphi %s713_s13, %s896_s13   ;;  %s674_s12 = sphi %s711_s12, %s895_s12  }
   0x4   : > { %s736_s18 = sadd.s32 1, %s686_s15   ;;  %s101_s19 = sadd.s32 1, %s682_s14 }
   0x5   : > { %s98_s20 = ssub.s32 %s686_s15, %s736_s18  ;;  %p111_p0 = scmp.ne.s32.totalorder %s682_s14, %s678_s13 }
   0x6   : > { %p99_p1 = scmp.eq.s32.totalorder %s98_s20, 0  ;;  %p112_p2 = scmp.eq.s32.totalorder %s732_s16, 1 }
   0x7   : > { %p117_p3 = scmp.ne.s32.totalorder %s678_s13, %s674_s12  ;;  %p118_p4 = scmp.eq.s32.totalorder %s547_s17, 1 }
   0x8   : > { %s747_s21 = scalar_select %p99_p1, %s682_s14, %s101_s19  }
   0x9   : > { %p749_p5 = por %p112_p2, %p111_p0  ;;  %p753_p6 = por %p118_p4, %p117_p3 }
   0xa   : > { %p550_p7 = scmp.ge.s32.totalorder %s686_s15, 1  ;;  %p161_p8 = scmp.lt.s32.totalorder %s686_s15, 3 }
   0xc   : > { %p162_p9 = pnand %p550_p7, %p161_p8 }
   0xd   : > { %s760_s24 = sshll.u32 (!%p162_p9), %s732_s16, 5  ;;  %s554_s30 = sshll.u32 (!%p162_p9), %s732_s16, 1  ;;  %v345_v40 = vlaneseq (!%p162_p9) }
   0xe   : > { %165 = sbr.rel (%p162_p9) target bundleno = 264 (0x108), region = 32  ;;  %p194_p10 = scmp.lt.s32.totalorder (!%p162_p9), %s760_s24, 63 }
   0xf   : > { %p200_p11 = scmp.lt.s32.totalorder (!%p162_p9), %s554_s30, 3  ;;  %v805_v45 = vshrl.u32 (!%p162_p9), %v345_v40, 7  ;;  %s560_s7 = sshll.u32 (!%p162_p9), %s732_s16, 8  ;;  %vm452_vm6 = vcmp.lt.s32.totalorder (!%p162_p9), %v345_v40, 256 }
  0x10   : > { %s190_s11 = sand.u32 (!%p162_p9), 1, %s678_s13  }
  0x11   : > { %v355_v50 = vsub.s32 (!%p162_p9), 1, %v805_v45  ;;  %v351_v54 = vsub.s32 (!%p162_p9), 0, %v805_v45  ;;  %v347_v55 = vadd.s32 (!%p162_p9), 8, %v805_v45  ;;  %s551_s16 = sshll.u32 (!%p162_p9), %s190_s11, 1  ;;  %s456_s27 = scalar_lea.sflag (!%p162_p9), [#allocation3], %s190_s11 }
  0x12   : > { %s192_s17 = scalar_lea.vmem (!%p162_p9), [#allocation2], %s551_s16 }
  0x13   : > { %s470_s19 = sshll.u32 (!%p162_p9), %s192_s17, 4  ;;  %s849_s19 = int_to_ptr.vmem [resolvable:$true] %s470_s19 }
  0x14   : > { %s624_s28 = scalar_lea.vmem (!%p162_p9), %s849_s19, 32 }
  0x15   : > { %s195_s25 = scalar_select %p194_p10, %s760_s24, 63 }
  0x16   : > { %s900_s30 = smov (!%p200_p11, %s554_s30), 3  ;;  %p625_p12 = scmp.ne.s32.totalorder %s849_s19, %s624_s28 }
  0x17   : > { %s553_s26 = sshll.u32 %s195_s25, 3  ;;  %s202_s6 = scalar_lea.vmem %s890_s1, %s900_s30 }
  0x18   : > { %s767_s29 = scalar_lea.vmem %s889_s0, %s553_s26  ;;  %v348_v51 = vld [vmem:[%s202_s6] sm:$0x3]  ;;  %s207_s10 = scalar_lea.vmem %s891_s2, %s900_s30 }
  0x19   : > { %v225_v0 = vld [vmem:[%s767_s29 + $0x80] sm:$0xff]  ;;  %v226_v2 = vld [vmem:[%s767_s29 + $0x88] sm:$0xff]  ;;  %v227_v4 = vld [vmem:[%s767_s29 + $0x90] sm:$0xff]  ;;  %v356_v59 = vrot.slane %v348_v51, %v355_v50  ;;  %s847_s26 = scalar_lea.hbm %s892_s3, %s760_s24  ;;  %p626_p13 = pnand %p625_p12, %p749_p5 }
  0x1a   : > { %v209_v1 = vld [vmem:[%s767_s29] sm:$0xff]  ;;  %273 = vxpose.xlu1.b32.start [1/16] (narrow) %v225_v0, 16  ;;  %v210_v3 = vld [vmem:[%s767_s29 + $0x8] sm:$0xff]  ;;  %v211_v5 = vld [vmem:[%s767_s29 + $0x10] sm:$0xff]  ;;  %v352_v0 = vrot.slane %v348_v51, %v351_v54 }
  0x1b   : > { %241 = vxpose.xlu0.b32.start [1/16] (narrow) %v209_v1, 16  ;;  %v228_v6 = vld [vmem:[%s767_s29 + $0x98] sm:$0xff]  ;;  %v229_v8 = vld [vmem:[%s767_s29 + $0xa0] sm:$0xff]  ;;  %v230_v10 = vld [vmem:[%s767_s29 + $0xa8] sm:$0xff]  ;;  %vm360_vm0 = vcmp.eq.s32.totalorder %v347_v55, %v356_v59  ;;  %vm358_vm1 = vcmp.eq.s32.totalorder %v805_v45, %v356_v59  ;;  %v423_v59 = vand.u32 127, %v345_v40  ;;  %p627_p0 = pneg %p626_p13 }
  0x1c   : > { %v212_v7 = vld [vmem:[%s767_s29 + $0x18] sm:$0xff]  ;;  %v213_v9 = vld [vmem:[%s767_s29 + $0x20] sm:$0xff]  ;;  %v214_v11 = vld [vmem:[%s767_s29 + $0x28] sm:$0xff]  ;;  %vm359_vm2 = vcmp.eq.s32.totalorder %v347_v55, %v352_v0  ;;  %vm357_vm3 = vcmp.eq.s32.totalorder %v805_v45, %v352_v0 }
  0x1d   : > { %v231_v12 = vld [vmem:[%s767_s29 + $0xb0] sm:$0xff]  ;;  %v232_v14 = vld [vmem:[%s767_s29 + $0xb8] sm:$0xff]  ;;  %v233_v16 = vld [vmem:[%s767_s29 + $0xc0] sm:$0xff] }
  0x1e   : > { %274 = vxpose.xlu1.b32.cont [2/16] (narrow) %v226_v2, 16  ;;  %v215_v13 = vld [vmem:[%s767_s29 + $0x30] sm:$0xff]  ;;  %v216_v15 = vld [vmem:[%s767_s29 + $0x38] sm:$0xff]  ;;  %v217_v17 = vld [vmem:[%s767_s29 + $0x40] sm:$0xff]  ;;  %v688_v2 = vmov 0.0  }
  0x1f   : > { %242 = vxpose.xlu0.b32.cont [2/16] (narrow) %v210_v3, 16  ;;  %v234_v18 = vld [vmem:[%s767_s29 + $0xc8] sm:$0xff]  ;;  %v235_v20 = vld [vmem:[%s767_s29 + $0xd0] sm:$0xff]  ;;  %v236_v22 = vld [vmem:[%s767_s29 + $0xd8] sm:$0xff]  ;;  %v559_v3 = vsel %vm360_vm0, 1.0, %v688_v2 }
  0x20   : > { %v218_v19 = vld [vmem:[%s767_s29 + $0x48] sm:$0xff]  ;;  %v219_v21 = vld [vmem:[%s767_s29 + $0x50] sm:$0xff]  ;;  %v220_v23 = vld [vmem:[%s767_s29 + $0x58] sm:$0xff] }
  0x21   : > { %v237_v24 = vld [vmem:[%s767_s29 + $0xe0] sm:$0xff]  ;;  %v238_v26 = vld [vmem:[%s767_s29 + $0xe8] sm:$0xff]  ;;  %v239_v28 = vld [vmem:[%s767_s29 + $0xf0] sm:$0xff] }
  0x22   : > { %275 = vxpose.xlu1.b32.cont [3/16] (narrow) %v227_v4, 16  ;;  %v221_v25 = vld [vmem:[%s767_s29 + $0x60] sm:$0xff]  ;;  %v222_v27 = vld [vmem:[%s767_s29 + $0x68] sm:$0xff]  ;;  %v223_v29 = vld [vmem:[%s767_s29 + $0x70] sm:$0xff]  ;;  %v557_v4 = vsel %vm358_vm1, 1.0, %v688_v2 }
  0x23   : > { %243 = vxpose.xlu0.b32.cont [3/16] (narrow) %v211_v5, 16  ;;  %v240_v30 = vld [vmem:[%s767_s29 + $0xf8] sm:$0xff]  ;;  %v558_v5 = vsel %vm359_vm2, 1.0, %v688_v2 }
  0x24   : > { %v224_v31 = vld [vmem:[%s767_s29 + $0x78] sm:$0xff]  ;;  %s690_s29 = smov [#allocation2]  }
  0x25   : > { %s628_s30 = sshll.u32 %s690_s29, 4  ;;  %s629_s30 = int_to_ptr.vmem [resolvable:$false] %s628_s30 }
  0x26   : > { %276 = vxpose.xlu1.b32.cont [4/16] (narrow) %v228_v6, 16  ;;  %s630_s4 = scalar_lea.vmem %s629_s30, 64  ;;  %p631_p1 = scmp.lt.s32.totalorder %s849_s19, %s629_s30 }
  0x27   : > { %244 = vxpose.xlu0.b32.cont [4/16] (narrow) %v212_v7, 16  ;;  %v556_v7 = vsel %vm357_vm3, 1.0, %v688_v2  ;;  %p632_p2 = scmp.lt.s32.totalorder %s630_s4, %s624_s28 }
  0x29   : > { %p633_p3 = por %p632_p2, %p631_p1 }
  0x2a   : > { %277 = vxpose.xlu1.b32.cont [5/16] (narrow) %v229_v8, 16 }
  0x2b   : > { %245 = vxpose.xlu0.b32.cont [5/16] (narrow) %v213_v9, 16  ;;  %p634_p4 = pnand %p633_p3, %p627_p0 }
  0x2e   : > { %278 = vxpose.xlu1.b32.cont [6/16] (narrow) %v230_v10, 16 }
  0x2f   : > { %246 = vxpose.xlu0.b32.cont [6/16] (narrow) %v214_v11, 16 }
  0x32   : > { %279 = vxpose.xlu1.b32.cont [7/16] (narrow) %v231_v12, 16 }
  0x33   : > { %247 = vxpose.xlu0.b32.cont [7/16] (narrow) %v215_v13, 16 }
  0x36   : > { %280 = vxpose.xlu1.b32.cont [8/16] (narrow) %v232_v14, 16 }
  0x37   : > { %248 = vxpose.xlu0.b32.cont [8/16] (narrow) %v216_v15, 16 }
  0x3a   : > { %281 = vxpose.xlu1.b32.cont [9/16] (narrow) %v233_v16, 16 }
  0x3b   : > { %249 = vxpose.xlu0.b32.cont [9/16] (narrow) %v217_v17, 16 }
  0x3e   : > { %282 = vxpose.xlu1.b32.cont [10/16] (narrow) %v234_v18, 16 }
  0x3f   : > { %250 = vxpose.xlu0.b32.cont [10/16] (narrow) %v218_v19, 16 }
  0x42   : > { %283 = vxpose.xlu1.b32.cont [11/16] (narrow) %v235_v20, 16 }
  0x43   : > { %251 = vxpose.xlu0.b32.cont [11/16] (narrow) %v219_v21, 16 }
  0x46   : > { %284 = vxpose.xlu1.b32.cont [12/16] (narrow) %v236_v22, 16 }
  0x47   : > { %252 = vxpose.xlu0.b32.cont [12/16] (narrow) %v220_v23, 16 }
  0x4a   : > { %285 = vxpose.xlu1.b32.cont [13/16] (narrow) %v237_v24, 16 }
  0x4b   : > { %253 = vxpose.xlu0.b32.cont [13/16] (narrow) %v221_v25, 16 }
  0x4e   : > { %286 = vxpose.xlu1.b32.cont [14/16] (narrow) %v238_v26, 16 }
  0x4f   : > { %254 = vxpose.xlu0.b32.cont [14/16] (narrow) %v222_v27, 16 }
  0x52   : > { %287 = vxpose.xlu1.b32.cont [15/16] (narrow) %v239_v28, 16 }
  0x53   : > { %255 = vxpose.xlu0.b32.cont [15/16] (narrow) %v223_v29, 16 }
  0x56   : > { %288 = vxpose.xlu1.b32.end [16/16] (narrow) %v240_v30, 16 }
  0x57   : > { %256 = vxpose.xlu0.b32.end [16/16] (narrow) %v224_v31, 16 }
  0x9a   : > { %v289_v32 = vpop.trf.xlu1 }
  0x9b   : > { %v257_v33 = vpop.trf.xlu0  ;;  %v370_v8 = vmul.f32 %v557_v4, %v289_v32 }
  0x9c   : > { %v369_v10 = vmul.f32 %v556_v7, %v257_v33 }
  0x9e   : > { %v290_v34 = vpop.trf.xlu1 }
  0x9f   : > { %v258_v35 = vpop.trf.xlu0  ;;  %v312_v36 = vmax.f32 %v289_v32, %v290_v34  ;;  %v372_v6 = vmul.f32 %v559_v3, %v290_v34  ;;  %v689_v3 = vmov 1966171168  }
  0xa0   : > { %v305_v37 = vmax.f32 %v257_v33, %v258_v35  ;;  %v371_v9 = vmul.f32 %v558_v5, %v258_v35  ;;  %v436_v4 = vunpack.c.l.s4 %v689_v3 }
  0xa1   : > { %v313_v38 = vrot.slane %v312_v36, 4  ;;  %v380_v11 = vadd.f32 %v372_v6, %v370_v8 }
  0xa2   : > { %v306_v39 = vrot.slane %v305_v37, 4  ;;  %v373_v14 = vadd.f32 %v371_v9, %v369_v10 }
  0xa3   : > { %v314_v41 = vmax.f32 %v312_v36, %v313_v38  ;;  %v381_v18 = vrot.slane %v380_v11, 4 }
  0xa4   : > { %v307_v42 = vmax.f32 %v305_v37, %v306_v39  ;;  %v374_v21 = vrot.slane %v373_v14, 4 }
  0xa5   : > { %v315_v43 = vrot.slane %v314_v41, 2  ;;  %v382_v24 = vadd.f32 %v381_v18, %v380_v11 }
  0xa6   : > { %v308_v44 = vrot.slane %v307_v42, 2  ;;  %v375_v27 = vadd.f32 %v374_v21, %v373_v14 }
  0xa7   : > { %v316_v46 = vmax.f32 %v314_v41, %v315_v43  ;;  %v383_v30 = vrot.slane %v382_v24, 2 }
  0xa8   : > { %v309_v47 = vmax.f32 %v307_v42, %v308_v44 }
  0xa9   : > { %v317_v48 = vrot.slane %v316_v46, 1  ;;  %v384_v36 = vadd.f32 %v383_v30, %v382_v24 }
  0xaa   : > { %v310_v49 = vrot.slane %v309_v47, 1 }
  0xab   : > { %v812_v52 = vmax.f32 %v316_v46, %v317_v48  ;;  %v385_v39 = vrot.slane %v384_v36, 1 }
  0xac   : > { %v814_v53 = vmax.f32 %v309_v47, %v310_v49 }
  0xad   : > { %v320_v56 = vsub.f32 %v289_v32, %v812_v52  ;;  %v322_v57 = vsub.f32 %v290_v34, %v812_v52  ;;  %v386_v42 = vadd.f32 %v385_v39, %v384_v36 }
  0xae   : > { %v319_v58 = vsub.f32 %v257_v33, %v814_v53  ;;  %v321_v60 = vsub.f32 %v258_v35, %v814_v53  ;;  %v376_v33 = vrot.slane %v375_v27, 2 }
  0xaf   : > { %v325_v61 = vmul.f32 1.442695, %v320_v56  ;;  %v329_v62 = vmul.f32 1.442695, %v322_v57  ;;  %v388_v46 = vsub.f32 %v386_v42, %v812_v52 }
  0xb0   : > { %v323_v63 = vmul.f32 1.442695, %v319_v58  ;;  %v327_v1 = vmul.f32 1.442695, %v321_v60  ;;  %v377_v38 = vadd.f32 %v376_v33, %v375_v27  ;;  %v424_v60 = vadd.s32 128, %v423_v59 }
  0xb1   : > { %608 = vpow2.f32 %v325_v61 }
  0xb2   : > { %610 = vpow2.f32 %v329_v62  ;;  %v378_v41 = vrot.slane %v377_v38, 1  ;;  %v425_v62 = vstv %s560_s7 }
  0xb3   : > { %612 = vpow2.f32 %v323_v63  ;;  %v427_v2 = vadd.s32 %v425_v62, %v424_v60  ;;  %v426_v8 = vadd.s32 %v425_v62, %v423_v59 }
  0xb4   : > { %614 = vpow2.f32 %v327_v1  ;;  %v379_v43 = vadd.f32 %v378_v41, %v377_v38 }
  0xb5   : > { %vm429_vm4 = vcmp.lt.s32.totalorder %v427_v2, 512  ;;  %vm428_vm5 = vcmp.lt.s32.totalorder %v426_v8, 512 }
  0xb6   : > { %v387_v51 = vsub.f32 %v379_v43, %v814_v53  ;;  %v407_v53 = vld [vmem:[%s207_s10] sm:$0x3] }
  0xb7   : > { %v416_v5 = vrot.slane %v407_v53, %v355_v50  ;;  %v412_v9 = vrot.slane %v407_v53, %v351_v54 }
  0xbb   : > { %v609_v12 = vpop.eup %608 }
  0xbc   : > { %v611_v13 = vpop.eup %610 }
  0xbd   : > { %v613_v15 = vpop.eup %612  ;;  %v338_v16 = vadd.f32 %v611_v13, %v609_v12  ;;  %v437_v12 = vunpack.c.0.s8 %v436_v4 }
  0xbe   : > { %v615_v17 = vpop.eup %614 }
  0xbf   : > { %v339_v19 = vrot.slane %v338_v16, 4  ;;  %v331_v20 = vadd.f32 %v615_v17, %v613_v15  ;;  %v440_v50 = vsub.s32 %v437_v12, %v805_v45 }
  0xc1   : > { %v340_v22 = vadd.f32 %v339_v19, %v338_v16  ;;  %v332_v23 = vrot.slane %v331_v20, 4 }
  0xc3   : > { %v341_v25 = vrot.slane %v340_v22, 2  ;;  %v333_v26 = vadd.f32 %v332_v23, %v331_v20 }
  0xc5   : > { %v342_v28 = vadd.f32 %v341_v25, %v340_v22  ;;  %v334_v29 = vrot.slane %v333_v26, 2 }
  0xc7   : > { %v343_v31 = vrot.slane %v342_v28, 1  ;;  %v335_v32 = vadd.f32 %v334_v29, %v333_v26 }
  0xc9   : > { %v344_v34 = vadd.f32 %v343_v31, %v342_v28  ;;  %v336_v35 = vrot.slane %v335_v32, 1 }
  0xcb   : > { %616 = vlog2.f32 %v344_v34  ;;  %v337_v37 = vadd.f32 %v336_v35, %v335_v32 }
  0xcd   : > { %618 = vlog2.f32 %v337_v37 }
  0xd5   : > { %v617_v44 = vpop.eup %616 }
  0xd6   : > { %v392_v47 = vmul.f32 0.6931472, %v617_v44 }
  0xd7   : > { %v619_v48 = vpop.eup %618 }
  0xd8   : > { %v394_v49 = vsub.f32 %v388_v46, %v392_v47  ;;  %v390_v55 = vmul.f32 0.6931472, %v619_v48 }
  0xda   : > { %v397_v56 = vmul.f32 1.442695, %v394_v49  ;;  %v393_v57 = vsub.f32 %v387_v51, %v390_v55 }
  0xdc   : > { %620 = vpow2.f32 %v397_v56  ;;  %v395_v58 = vmul.f32 1.442695, %v393_v57 }
  0xde   : > { %622 = vpow2.f32 %v395_v58 }
  0xe6   : > { %v621_v52 = vpop.eup %620 }
  0xe7   : > { %v400_v61 = vadd.f32 1e-06, %v621_v52 }
  0xe8   : > { %v623_v63 = vpop.eup %622 }
  0xe9   : > { %v402_v0 = vsub.f32 1.0, %v400_v61  ;;  %v399_v1 = vadd.f32 1e-06, %v623_v63 }
  0xeb   : > { %v404_v6 = vsub.f32 0.0, %v402_v0  ;;  %v401_v7 = vsub.f32 1.0, %v399_v1 }
  0xed   : > { %v406_v10 = vmul.f32 %v404_v6, %v394_v49  ;;  %v403_v11 = vsub.f32 0.0, %v401_v7 }
  0xef   : > { %v405_v13 = vmul.f32 %v403_v11, %v393_v57  ;;  %v420_v14 = vmul.f32 %v416_v5, %v406_v10 }
  0xf1   : > { %v419_v15 = vmul.f32 %v412_v9, %v405_v13  ;;  %v431_v16 = vsel %vm429_vm4, %v420_v14, 0.0 }
  0xf3   : > { %v430_v17 = vsel %vm428_vm5, %v419_v15, 0.0 }
  0xf4   : > { %v434_v18 = vcombine.low %v430_v17, %v431_v16 }
  0xf6   : > { %v441_v19 = vrot.slane %v434_v18, %v440_v50 }
  0xf8   : > { %v448_v54 = vrot.slane %v441_v19, %v440_v50 }
  0xfa   : > { %454 = vst.msk [vmem:[%s192_s17] sm:$0x3] %vm452_vm6, %v448_v54 }
  0xfb   : > { %637 = shalt.err (!%p634_p4)
}
  0xfc   : > { %s638_s24 = scalar_lea.hbm %s847_s26, 32  ;;  %s642_s7 = scalar_lea.hbm %s892_s3, 64 }
  0xfd   : > { %p639_p7 = scmp.ne.s32.totalorder %s847_s26, %s638_s24  ;;  %p643_p10 = scmp.lt.u32.totalorder %s847_s26, %s892_s3 }
  0xfe   : > { %p644_p11 = scmp.lt.u32.totalorder %s642_s7, %s638_s24  ;;  %p646_p13 = scmp.lt.u32.totalorder %s638_s24, %s847_s26 }
  0xff   : > { %p640_p8 = pnand %p639_p7, %p749_p5 }
 0x100   : > { %p645_p12 = por %p644_p11, %p643_p10 }
 0x101   : > { %p641_p9 = pneg %p640_p8 }
 0x102   : > { %p647_p0 = por %p646_p13, %p645_p12 }
 0x104   : > { %p648_p1 = pnand %p647_p0, %p641_p9 }
 0x106   : > { %651 = shalt.err (!%p648_p1)
}
 0x107   : > { %567 = dma.vmem_to_hbm [thread:$0]  (%p749_p5), %s849_s19, 32, %s847_s26, %s456_s27  }
 0x108 PF: > { %p573_p2 = scmp.ge.s32.totalorder %s686_s15, 2  ;;  %s482_s10 = sand.u32 1, %s674_s12  }
 0x109   : > { %s483_s11 = scalar_lea.sflag [#allocation3], %s482_s10 }
 0x10a   : > { %p570_p3 = pnand %p573_p2, %p753_p6 }
 0x10c   : > { %669 = dma.done.wait (!%p570_p3), %s483_s11, 32  }
 0x10d   : > { %671 = vsyncadd (!%p570_p3), %s483_s11, 4294967264  ;;  %p13_p4 = scmp.ge.s32.totalorder %s736_s18, 4   ;;  %s895_s12 = smov %s678_s13 }
 0x10e   : > { %s896_s13 = smov %s682_s14  ;;  %s897_s14 = smov %s747_s21 }
 0x10f   : > { %s898_s15 = smov %s736_s18  ;;  %15 = sbr.rel (!%p13_p4) target bundleno = 3 (0x3), region = 73 }
 0x116   :  { %488 = vsyncpa [#allocation3], 1 }
 0x117   :  { %490 = vsyncpa [#allocation3 + $0x1], 1 }

</bundles_post_ra>
